<compile_context>
chip_gen: v6e
topology: v6e:2x2x1
jax: 0.10.0
libtpu: 0.0.40
codegen_flags: <defaults>
</compile_context>

<pallas_src>
import math

import jax
import jax.numpy as jnp
from jax import lax
from jax.experimental import pallas as pl
from jax.experimental.pallas import tpu as pltpu


def make_drop_residual_norm_kernel(eps: float):
    def kernel(x_ref, h_ref, w_ref, b_ref, g_ref, beta_ref, o_ref):
        # Linear projection on the MXU: operands in native dtype, f32 accum.
        y = jnp.dot(h_ref[...], w_ref[...],
                    preferred_element_type=jnp.float32)          # (tm, D) f32
        y = y + b_ref[...].astype(jnp.float32)

        # Dropout: identity in eval mode (see TODO above).

        # Residual add + LayerNorm over the lane (last) axis, all in f32.
        z = y + x_ref[...].astype(jnp.float32)                   # (tm, D)
        mean = jnp.mean(z, axis=-1, keepdims=True)                # (tm, 1)
        zc = z - mean
        var = jnp.mean(zc * zc, axis=-1, keepdims=True)           # biased var
        inv = lax.rsqrt(var + eps)                                # EUP rsqrt
        out = zc * inv * g_ref[...].astype(jnp.float32) \
              + beta_ref[...].astype(jnp.float32)
        o_ref[...] = out.astype(o_ref.dtype)

    return kernel


def drop_residual_norm(input_tensor, hidden_states, params, *,
                       eps: float = 1e-5, row_tile: int = 256):
    """input_tensor, hidden_states: (..., D) -> (..., D)."""
    orig_shape = input_tensor.shape
    D = orig_shape[-1]
    M = math.prod(orig_shape[:-1])

    x = input_tensor.reshape(M, D)
    h = hidden_states.reshape(M, D)

    # PyTorch Linear weight is (out, in); pre-transpose to (in, out) so the
    # kernel computes h @ W directly. Per-lane vectors become (1, D) rows.
    w = params["w"].T
    b = params["b"].reshape(1, D)
    gamma = params["gamma"].reshape(1, D)
    beta = params["beta"].reshape(1, D)

    # Few, large row tiles; rows are independent => "parallel" grid axis.
    tm = M if M <= row_tile else row_tile
    assert M % tm == 0, "row count must divide evenly into tiles for this demo"
    grid = (M // tm,)

    vec_spec = pl.BlockSpec((1, D), lambda i: (0, 0))

    out = pl.pallas_call(
        make_drop_residual_norm_kernel(eps),
        out_shape=jax.ShapeDtypeStruct((M, D), input_tensor.dtype),
        grid=grid,
        in_specs=[
            pl.BlockSpec((tm, D), lambda i: (i, 0)),   # input_tensor rows
            pl.BlockSpec((tm, D), lambda i: (i, 0)),   # hidden_states rows
            pl.BlockSpec((D, D), lambda i: (0, 0)),    # linear weight (resident)
            vec_spec,                                   # linear bias
            vec_spec,                                   # layernorm gamma
            vec_spec,                                   # layernorm beta
        ],
        out_specs=pl.BlockSpec((tm, D), lambda i: (i, 0)),
        compiler_params=pltpu.CompilerParams(
            dimension_semantics=("parallel",)),
    )(x, h, w, b, gamma, beta)

    return out.reshape(orig_shape)


def reference_drop_residual_norm(input_tensor, hidden_states, params, *,
                                 eps: float = 1e-5):
    """Pure-JAX reference matching the PyTorch forward (dropout in eval mode)."""
    h = jnp.einsum("...d,od->...o", hidden_states, params["w"]) + params["b"]
    z = h + input_tensor
    mean = jnp.mean(z, axis=-1, keepdims=True)
    var = jnp.mean((z - mean) ** 2, axis=-1, keepdims=True)
    zn = (z - mean) / jnp.sqrt(var + eps)
    return zn * params["gamma"] + params["beta"]


if __name__ == "__main__":
    # Small but lane-dense shapes: batch=2, seq=8, dim=128.
    B, S, D = 2, 8, 128

    key = jax.random.PRNGKey(0)
    keys = jax.random.split(key, 6)

    # PyTorch Linear init shapes: weight (out, in), bias (out,).
    bound = 1.0 / math.sqrt(D)
    params = {
        "w": jax.random.uniform(keys[0], (D, D), jnp.float32, -bound, bound),
        "b": jax.random.uniform(keys[1], (D,), jnp.float32, -bound, bound),
        "gamma": jax.random.normal(keys[2], (D,), jnp.float32) * 0.1 + 1.0,
        "beta": jax.random.normal(keys[3], (D,), jnp.float32) * 0.1,
    }

    input_tensor = jax.random.normal(keys[4], (B, S, D), jnp.float32)
    hidden_states = jax.random.normal(keys[5], (B, S, D), jnp.float32)

    out = drop_residual_norm(input_tensor, hidden_states, params, eps=1e-5)
    out = jax.block_until_ready(out)

    ref = reference_drop_residual_norm(input_tensor, hidden_states, params,
                                       eps=1e-5)
    assert out.shape == (B, S, D)
    assert jnp.allclose(out, ref, atol=1e-4, rtol=1e-4), "mismatch vs reference"

    print("KERNEL_OK")
</pallas_src>

<mosaic_0001>
module attributes {stable_mosaic.version = 11 : i64} {
  func.func @kernel(%arg0: i32, %arg1: memref<16x128xf32, #tpu.memory_space<vmem>>, %arg2: memref<16x128xf32, #tpu.memory_space<vmem>>, %arg3: memref<128x128xf32, #tpu.memory_space<vmem>>, %arg4: memref<1x128xf32, #tpu.memory_space<vmem>>, %arg5: memref<1x128xf32, #tpu.memory_space<vmem>>, %arg6: memref<1x128xf32, #tpu.memory_space<vmem>>, %arg7: memref<16x128xf32, #tpu.memory_space<vmem>>) attributes {dimension_semantics = [#tpu.dimension_semantics<parallel>], iteration_bounds = array<i64: 1>, scalar_prefetch = 0 : i64, scratch_operands = 0 : i64, tpu.core_type = #tpu.core_type<tc>, window_params = [{transform_indices = @transform_0, window_bounds = array<i64: 16, 128>}, {transform_indices = @transform_1, window_bounds = array<i64: 16, 128>}, {pipeline_mode = #tpu.pipeline_mode<synchronous>, transform_indices = @transform_2, window_bounds = array<i64: 128, 128>}, {pipeline_mode = #tpu.pipeline_mode<synchronous>, transform_indices = @transform_3, window_bounds = array<i64: 1, 128>}, {pipeline_mode = #tpu.pipeline_mode<synchronous>, transform_indices = @transform_4, window_bounds = array<i64: 1, 128>}, {pipeline_mode = #tpu.pipeline_mode<synchronous>, transform_indices = @transform_5, window_bounds = array<i64: 1, 128>}, {transform_indices = @transform_6, window_bounds = array<i64: 16, 128>}]} {
    %c0 = arith.constant 0 : index
    %c0_0 = arith.constant 0 : index
    %0 = vector.load %arg2[%c0, %c0_0] : memref<16x128xf32, #tpu.memory_space<vmem>>, vector<16x128xf32>
    %c0_1 = arith.constant 0 : index
    %c0_2 = arith.constant 0 : index
    %1 = vector.load %arg3[%c0_1, %c0_2] : memref<128x128xf32, #tpu.memory_space<vmem>>, vector<128x128xf32>
    %cst = arith.constant dense<0.000000e+00> : vector<16x128xf32>
    %2 = tpu.matmul %0, %1, %cst {dimension_numbers = #tpu.dot_dimension_numbers<[1], [0], [0], [1], [0, 0, 1, 1], [], []>} : vector<16x128xf32>, vector<128x128xf32>, vector<16x128xf32> -> vector<16x128xf32>
    %c0_3 = arith.constant 0 : index
    %c0_4 = arith.constant 0 : index
    %3 = vector.load %arg4[%c0_3, %c0_4] : memref<1x128xf32, #tpu.memory_space<vmem>>, vector<1x128xf32>
    %4 = vector.broadcast %3 : vector<1x128xf32> to vector<16x128xf32>
    %5 = arith.addf %2, %4 : vector<16x128xf32>
    %c0_5 = arith.constant 0 : index
    %c0_6 = arith.constant 0 : index
    %6 = vector.load %arg1[%c0_5, %c0_6] : memref<16x128xf32, #tpu.memory_space<vmem>>, vector<16x128xf32>
    %7 = arith.addf %5, %6 : vector<16x128xf32>
    %cst_7 = arith.constant dense<0.000000e+00> : vector<16xf32>
    %8 = vector.multi_reduction <add>, %7, %cst_7 [1] : vector<16x128xf32> to vector<16xf32>
    %9 = vector.shape_cast %8 : vector<16xf32> to vector<16x1xf32>
    %cst_8 = arith.constant 1.280000e+02 : f32
    %10 = vector.broadcast %cst_8 : f32 to vector<16x1xf32>
    %11 = arith.divf %9, %10 : vector<16x1xf32>
    %12 = vector.broadcast %11 : vector<16x1xf32> to vector<16x128xf32>
    %13 = arith.subf %7, %12 : vector<16x128xf32>
    %14 = arith.mulf %13, %13 : vector<16x128xf32>
    %cst_9 = arith.constant dense<0.000000e+00> : vector<16xf32>
    %15 = vector.multi_reduction <add>, %14, %cst_9 [1] : vector<16x128xf32> to vector<16xf32>
    %16 = vector.shape_cast %15 : vector<16xf32> to vector<16x1xf32>
    %cst_10 = arith.constant 1.280000e+02 : f32
    %17 = vector.broadcast %cst_10 : f32 to vector<16x1xf32>
    %18 = arith.divf %16, %17 : vector<16x1xf32>
    %cst_11 = arith.constant 9.99999974E-6 : f32
    %19 = vector.broadcast %cst_11 : f32 to vector<16x1xf32>
    %20 = arith.addf %18, %19 : vector<16x1xf32>
    %21 = math.rsqrt %20 : vector<16x1xf32>
    %22 = vector.broadcast %21 : vector<16x1xf32> to vector<16x128xf32>
    %23 = arith.mulf %13, %22 : vector<16x128xf32>
    %c0_12 = arith.constant 0 : index
    %c0_13 = arith.constant 0 : index
    %24 = vector.load %arg5[%c0_12, %c0_13] : memref<1x128xf32, #tpu.memory_space<vmem>>, vector<1x128xf32>
    %25 = vector.broadcast %24 : vector<1x128xf32> to vector<16x128xf32>
    %26 = arith.mulf %23, %25 : vector<16x128xf32>
    %c0_14 = arith.constant 0 : index
    %c0_15 = arith.constant 0 : index
    %27 = vector.load %arg6[%c0_14, %c0_15] : memref<1x128xf32, #tpu.memory_space<vmem>>, vector<1x128xf32>
    %28 = vector.broadcast %27 : vector<1x128xf32> to vector<16x128xf32>
    %29 = arith.addf %26, %28 : vector<16x128xf32>
    %c0_16 = arith.constant 0 : index
    %c0_17 = arith.constant 0 : index
    %30 = vector.load %arg7[%c0_16, %c0_17] : memref<16x128xf32, #tpu.memory_space<vmem>>, vector<16x128xf32>
    tpu.vector_store %arg7[%c0_16, %c0_17], %29 {strides = array<i32>} : memref<16x128xf32, #tpu.memory_space<vmem>>, vector<16x128xf32>,
    return
  }
  func.func @transform_0(%arg0: i32) -> (i32, i32) {
    %c0_i32 = arith.constant 0 : i32
    %c0_i32_0 = arith.constant 0 : i32
    return %arg0, %c0_i32 : i32, i32
  }
  func.func @transform_1(%arg0: i32) -> (i32, i32) {
    %c0_i32 = arith.constant 0 : i32
    %c0_i32_0 = arith.constant 0 : i32
    return %arg0, %c0_i32 : i32, i32
  }
  func.func @transform_2(%arg0: i32) -> (i32, i32) {
    %c0_i32 = arith.constant 0 : i32
    %c0_i32_0 = arith.constant 0 : i32
    %c0_i32_1 = arith.constant 0 : i32
    return %c0_i32, %c0_i32_0 : i32, i32
  }
  func.func @transform_3(%arg0: i32) -> (i32, i32) {
    %c0_i32 = arith.constant 0 : i32
    %c0_i32_0 = arith.constant 0 : i32
    %c0_i32_1 = arith.constant 0 : i32
    return %c0_i32, %c0_i32_0 : i32, i32
  }
  func.func @transform_4(%arg0: i32) -> (i32, i32) {
    %c0_i32 = arith.constant 0 : i32
    %c0_i32_0 = arith.constant 0 : i32
    %c0_i32_1 = arith.constant 0 : i32
    return %c0_i32, %c0_i32_0 : i32, i32
  }
  func.func @transform_5(%arg0: i32) -> (i32, i32) {
    %c0_i32 = arith.constant 0 : i32
    %c0_i32_0 = arith.constant 0 : i32
    %c0_i32_1 = arith.constant 0 : i32
    return %c0_i32, %c0_i32_0 : i32, i32
  }
  func.func @transform_6(%arg0: i32) -> (i32, i32) {
    %c0_i32 = arith.constant 0 : i32
    %c0_i32_0 = arith.constant 0 : i32
    return %arg0, %c0_i32 : i32, i32
  }
}

</mosaic_0001>

<bundles_post_ra>
// kernel: tpu_custom_call.1
= control target key start
LH: loop header
LB: loop body
LE: loop exit
PB: predicated region body
PF: predicated region fallthrough
CT: control target
= control target key end

     0   :  { %11 = vsyncpa [#allocation3], 0  ;;  %s456_s0 = inlined_call_operand.hbm [shape: f32[16,128], index: 0, kind: input, shape index: {}]   ;;  %s457_s1 = inlined_call_operand.hbm [shape: f32[16,128], index: 1, kind: input, shape index: {}]   ;;  %s458_s2 = inlined_call_operand.hbm [shape: f32[128,128], index: 2, kind: input, shape index: {}]   ;;  %s459_s3 = inlined_call_operand.vmem [shape: f32[1,128], index: 3, kind: input, shape index: {}]   ;;  %s460_s4 = inlined_call_operand.vmem [shape: f32[1,128], index: 4, kind: input, shape index: {}]   ;;  %s461_s5 = inlined_call_operand.vmem [shape: f32[1,128], index: 5, kind: input, shape index: {}]   ;;  %s462_s6 = inlined_call_operand.hbm [shape: f32[16,128], index: 6, kind: output, shape index: {}]  }
   0x1   :  { %12 = vsyncpa [#allocation6], 0 }
   0x2   :  { %13 = vsyncpa [#allocation4], 0  ;;  %s382_s21 = smov [#allocation5]   ;;  %s383_s23 = smov [#allocation2]  }
   0x3   :  { %s31_s22 = sshll.u32 %s382_s21, 4  ;;  %s19_s24 = sshll.u32 %s383_s23, 4  ;;  %s32_s22 = int_to_ptr.vmem [resolvable:$true] %s31_s22  ;;  %s20_s24 = int_to_ptr.vmem [resolvable:$true] %s19_s24 }
   0x4   :  { %s304_s25 = scalar_lea.vmem %s32_s22, 256  ;;  %p309_p1 = scmp.lt.s32.totalorder %s32_s22, %s32_s22 }
   0x5   :  { %p305_p0 = scmp.ne.s32.totalorder %s32_s22, %s304_s25  ;;  %p310_p2 = scmp.lt.s32.totalorder %s304_s25, %s304_s25 }
   0x7   :  { %p311_p3 = por %p310_p2, %p309_p1 }
   0x9   :  { %p312_p4 = pnand %p311_p3, %p305_p0 }
   0xb   :  { %315 = shalt.err (!%p312_p4)
}
   0xc   :  { %s384_s26 = smov 128   ;;  %s385_s27 = smov 8  }
   0xd   :  { %37 = dma.hbm_to_vmem [thread:$0]  %s457_s1, 256, %s32_s22, [#allocation6], %s384_s26, %s384_s26, %s385_s27  }
   0xe   :  { %s324_s30 = scalar_lea.vmem %s20_s24, 256  ;;  %p329_p6 = scmp.lt.s32.totalorder %s20_s24, %s20_s24 }
   0xf   :  { %p325_p5 = scmp.ne.s32.totalorder %s20_s24, %s324_s30  ;;  %p330_p7 = scmp.lt.s32.totalorder %s324_s30, %s324_s30 }
  0x11   :  { %p331_p8 = por %p330_p7, %p329_p6 }
  0x13   :  { %p332_p9 = pnand %p331_p8, %p325_p5 }
  0x15   :  { %335 = shalt.err (!%p332_p9)
}
  0x16   :  { %25 = dma.hbm_to_vmem [thread:$0]  %s456_s0, 256, %s20_s24, [#allocation3], %s384_s26, %s384_s26, %s385_s27  }
  0x17   :  { %s386_s9 = smov [#allocation7]  }
  0x18   :  { %s43_s10 = sshll.u32 %s386_s9, 4  ;;  %s44_s10 = int_to_ptr.vmem [resolvable:$true] %s43_s10 }
  0x19   :  { %s344_s11 = scalar_lea.vmem %s44_s10, 2048  ;;  %p349_p11 = scmp.lt.s32.totalorder %s44_s10, %s44_s10 }
  0x1a   :  { %p345_p10 = scmp.ne.s32.totalorder %s44_s10, %s344_s11  ;;  %p350_p12 = scmp.lt.s32.totalorder %s344_s11, %s344_s11 }
  0x1c   :  { %p351_p13 = por %p350_p12, %p349_p11 }
  0x1e   :  { %p352_p0 = pnand %p351_p13, %p345_p10 }
  0x20   :  { %355 = shalt.err (!%p352_p0)
}
  0x21   :  { %49 = dma.hbm_to_vmem [thread:$0]  %s458_s2, 2048, %s44_s10, [#allocation6], %s384_s26, %s384_s26, %s385_s27  }
  0x22   :  { %376 = dma.done.wait [#allocation3], 256  }
  0x23   :  { %377 = vsyncadd [#allocation3], 4294967040 }
  0x24   :  { %378 = dma.done.wait [#allocation6], 2304  }
  0x25   :  { %379 = vsyncadd [#allocation6], 4294964992  ;;  %v82_v0 = vld [vmem:[#allocation7 + $0x78] sm:$0xff]  ;;  %v81_v1 = vld [vmem:[#allocation7 + $0x70] sm:$0xff]  ;;  %s387_s16 = smov [#allocation8]  }
  0x26   :  { %251 = vmatprep.subr.mxu0 %v82_v0  ;;  %v80_v2 = vld [vmem:[#allocation7 + $0x68] sm:$0xff]  ;;  %v79_v3 = vld [vmem:[#allocation7 + $0x60] sm:$0xff]  ;;  %v65_v4 = vld [vmem:[#allocation5] sm:$0xff]  ;;  %s217_s17 = sshll.u32 %s387_s16, 4  ;;  %s218_s17 = int_to_ptr.vmem [resolvable:$true] %s217_s17 }
  0x27   :  { %252 = vmatpush3.msra.mxu0 %v82_v0  ;;  %v78_v5 = vld [vmem:[#allocation7 + $0x58] sm:$0xff]  ;;  %283 = vmatprep.mubr.f32.mxu0 %v65_v4  ;;  %v77_v6 = vld [vmem:[#allocation7 + $0x50] sm:$0xff]  ;;  %v76_v7 = vld [vmem:[#allocation7 + $0x48] sm:$0xff]  ;;  %s356_s18 = scalar_lea.vmem %s218_s17, 256  ;;  %p361_p2 = scmp.lt.s32.totalorder %s218_s17, %s218_s17 }
  0x28   :  { %253 = vmatprep.subr.mxu0 %v81_v1  ;;  %v75_v8 = vld [vmem:[#allocation7 + $0x40] sm:$0xff]  ;;  %v74_v9 = vld [vmem:[#allocation7 + $0x38] sm:$0xff]  ;;  %v73_v10 = vld [vmem:[#allocation7 + $0x30] sm:$0xff]  ;;  %p357_p1 = scmp.ne.s32.totalorder %s218_s17, %s356_s18  ;;  %p362_p3 = scmp.lt.s32.totalorder %s356_s18, %s356_s18 }
  0x29   :  { %254 = vmatpush3.msra.mxu0 %v81_v1  ;;  %v72_v11 = vld [vmem:[#allocation7 + $0x28] sm:$0xff]  ;;  %v71_v12 = vld [vmem:[#allocation7 + $0x20] sm:$0xff]  ;;  %v70_v13 = vld [vmem:[#allocation7 + $0x18] sm:$0xff] }
  0x2a   :  { %255 = vmatprep.subr.mxu0 %v80_v2  ;;  %v69_v14 = vld [vmem:[#allocation7 + $0x10] sm:$0xff]  ;;  %v68_v15 = vld [vmem:[#allocation7 + $0x8] sm:$0xff]  ;;  %v67_v16 = vld [vmem:[#allocation7] sm:$0xff]  ;;  %p363_p4 = por %p362_p3, %p361_p2 }
  0x2b   :  { %256 = vmatpush3.msra.mxu0 %v80_v2  ;;  %v66_v17 = vld [vmem:[#allocation5 + $0x8] sm:$0xff]  ;;  %v230_v19 = vld [vmem:[%s459_s3] ss:$0 sm:$0xff]  ;;  %v166_v25 = vld [vmem:[#allocation2 + $0x8] sm:$0xff] }
  0x2c   :  { %257 = vmatprep.subr.mxu0 %v79_v3  ;;  %v165_v21 = vld [vmem:[#allocation2] sm:$0xff]  ;;  %p364_p5 = pnand %p363_p4, %p357_p1 }
  0x2d   :  { %258 = vmatpush3.msra.mxu0 %v79_v3  ;;  %v231_v42 = vld [vmem:[%s460_s4] ss:$0 sm:$0xff] }
  0x2e   :  { %259 = vmatprep.subr.mxu0 %v78_v5  ;;  %v232_v44 = vld [vmem:[%s461_s5] ss:$0 sm:$0xff] }
  0x2f   :  { %260 = vmatpush3.msra.mxu0 %v78_v5 }
  0x30   :  { %261 = vmatprep.subr.mxu0 %v77_v6 }
  0x31   :  { %262 = vmatpush3.msra.mxu0 %v77_v6 }
  0x32   :  { %263 = vmatprep.subr.mxu0 %v76_v7 }
  0x33   :  { %264 = vmatpush3.msra.mxu0 %v76_v7 }
  0x34   :  { %265 = vmatprep.subr.mxu0 %v75_v8 }
  0x35   :  { %266 = vmatpush3.msra.mxu0 %v75_v8 }
  0x36   :  { %267 = vmatprep.subr.mxu0 %v74_v9 }
  0x37   :  { %268 = vmatpush3.msra.mxu0 %v74_v9 }
  0x38   :  { %269 = vmatprep.subr.mxu0 %v73_v10 }
  0x39   :  { %270 = vmatpush3.msra.mxu0 %v73_v10 }
  0x3a   :  { %271 = vmatprep.subr.mxu0 %v72_v11 }
  0x3b   :  { %272 = vmatpush3.msra.mxu0 %v72_v11 }
  0x3c   :  { %273 = vmatprep.subr.mxu0 %v71_v12 }
  0x3d   :  { %274 = vmatpush3.msra.mxu0 %v71_v12 }
  0x3e   :  { %275 = vmatprep.subr.mxu0 %v70_v13 }
  0x3f   :  { %276 = vmatpush3.msra.mxu0 %v70_v13 }
  0x40   :  { %277 = vmatprep.subr.mxu0 %v69_v14 }
  0x41   :  { %278 = vmatpush3.msra.mxu0 %v69_v14 }
  0x42   :  { %279 = vmatprep.subr.mxu0 %v68_v15 }
  0x43   :  { %280 = vmatpush3.msra.mxu0 %v68_v15 }
  0x44   :  { %281 = vmatprep.subr.mxu0 %v67_v16 }
  0x45   :  { %282 = vmatpush3.msra.mxu0 %v67_v16 }
  0x46   :  { %284 = vmatmul.mubr.f32.vlgmr.msra.gmra.mxu0 %v66_v17 }
 0x106   :  { %v285_v18 = vpop.f32.mrf.mxu0 }
 0x107   :  { %v162_v23 = vadd.f32 %v285_v18, %v230_v19 }
 0x108   :  { %v156_v20 = vpop.f32.mrf.mxu0 }
 0x109   :  { %v157_v22 = vadd.f32 %v230_v19, %v156_v20  ;;  %v168_v26 = vadd.f32 %v166_v25, %v162_v23 }
 0x10b   :  { %v167_v24 = vadd.f32 %v165_v21, %v157_v22 }
 0x10d   :  { %169 = vadd.xlane.f32.xlu0 %v167_v24 }
 0x111   :  { %171 = vadd.xlane.f32.xlu0 %v168_v26 }
 0x196   :  { %v170_v27 = vpop.xlane.xlu0 %169 }
 0x197   :  { %v174_v28 = vmul.f32 0.0078125, %v170_v27 }
 0x199   :  { %v176_v29 = vsub.f32 %v167_v24, %v174_v28 }
 0x19a   :  { %v172_v30 = vpop.xlane.xlu0 %171 }
 0x19b   :  { %v175_v31 = vmul.f32 0.0078125, %v172_v30  ;;  %v178_v32 = vmul.f32 %v176_v29, %v176_v29 }
 0x19d   :  { %v177_v33 = vsub.f32 %v168_v26, %v175_v31  ;;  %180 = vadd.xlane.f32.xlu1 %v178_v32 }
 0x19f   :  { %v179_v34 = vmul.f32 %v177_v33, %v177_v33 }
 0x1a1   :  { %182 = vadd.xlane.f32.xlu1 %v179_v34 }
 0x226   :  { %v181_v35 = vpop.xlane.xlu1 %180 }
 0x227   :  { %v184_v36 = vmul.f32 0.0078125, %v181_v35 }
 0x229   :  { %v186_v37 = vadd.f32 1e-05, %v184_v36 }
 0x22a   :  { %v183_v38 = vpop.xlane.xlu1 %182 }
 0x22b   :  { %292 = vrsqrt.f32 %v186_v37  ;;  %v185_v39 = vmul.f32 0.0078125, %v183_v38 }
 0x22d   :  { %v187_v40 = vadd.f32 1e-05, %v185_v39 }
 0x22f   :  { %294 = vrsqrt.f32 %v187_v40 }
 0x238   :  { %v293_v41 = vpop.eup %292 }
 0x239   :  { %v190_v43 = vmul.f32 %v293_v41, %v176_v29 }
 0x23b   :  { %v199_v45 = vmul.f32 %v231_v42, %v190_v43 }
 0x23c   :  { %v295_v46 = vpop.eup %294 }
 0x23d   :  { %v191_v47 = vmul.f32 %v295_v46, %v177_v33  ;;  %v208_v48 = vadd.f32 %v232_v44, %v199_v45 }
 0x23f   :  { %v200_v49 = vmul.f32 %v231_v42, %v191_v47  ;;  %210 = vst [vmem:[#allocation8] sm:$0xff] %v208_v48 }
 0x241   :  { %v209_v50 = vadd.f32 %v232_v44, %v200_v49 }
 0x243   :  { %211 = vst [vmem:[#allocation8 + $0x8] sm:$0xff] %v209_v50 }
 0x244   :  { %367 = shalt.err (!%p364_p5)
}
 0x245   :  { %223 = dma.vmem_to_hbm [thread:$0]  %s218_s17, 256, %s462_s6, [#allocation4], %s384_s26, %s384_s26, %s385_s27  }
 0x246   :  { %380 = dma.done.wait [#allocation4], 256  }
 0x247   :  { %381 = vsyncadd [#allocation4], 4294967040 }
 0x248   :  { %227 = vsyncpa [#allocation3], 1 }
 0x249   :  { %228 = vsyncpa [#allocation6], 1 }
 0x24a   :  { %229 = vsyncpa [#allocation4], 1 }

</bundles_post_ra>
